<compile_context>
chip_gen: v6e
topology: v6e:2x2x1
jax: 0.10.0
libtpu: 0.0.40
codegen_flags: <defaults>
</compile_context>

<pallas_src>
import jax
import jax.numpy as jnp
from jax import lax
from jax.experimental import pallas as pl
from jax.experimental.pallas import tpu as pltpu


def _round_up(x, m):
    return ((x + m - 1) // m) * m


def logreg_kernel(x_ref, w_ref, o_ref, acc_ref):
    """One (TILE_B, TILE_K) x (N_PAD, TILE_K) step of sigmoid(X @ W.T)."""
    k = pl.program_id(1)

    @pl.when(k == 0)
    def _():
        acc_ref[...] = jnp.zeros_like(acc_ref)

    # X @ W.T on the MXU: contract the last axis of X with the last axis of W,
    # accumulating in f32.  No HBM transpose of W is ever materialized.
    acc_ref[...] += lax.dot_general(
        x_ref[...],
        w_ref[...],
        dimension_numbers=(((1,), (1,)), ((), ())),
        preferred_element_type=jnp.float32,
    )

    @pl.when(k == pl.num_programs(1) - 1)
    def _():
        # Sigmoid epilogue on the f32 accumulator (lax.logistic -> EUP).
        o_ref[...] = jax.nn.sigmoid(acc_ref[...]).astype(o_ref.dtype)


def logreg_forward(x, weight, *, compute_dtype=jnp.float32,
                   tile_b_max=512, tile_k_max=2048):
    """sigmoid(x @ weight.T); weight has PyTorch layout [result_dim, input_dim]."""
    B, K = x.shape
    N, Kw = weight.shape
    assert K == Kw, "weight must be [result_dim, input_dim]"

    # ---- tiling decisions --------------------------------------------------
    # Lane-dense output slab: pad the class dim up to a multiple of 128 so the
    # final store is a full-lane (unmasked) vst; sliced off in the wrapper.
    n_pad = _round_up(max(N, 128), 128)

    # Reduction (K) tiling: full K when small, else MXU-friendly 2048 chunks
    # (multiple of 256) with zero padding so padded columns contribute 0.
    if K <= tile_k_max:
        tile_k, k_pad = K, K
    else:
        tile_k = tile_k_max
        k_pad = _round_up(K, tile_k)

    # Batch tiling: big tiles (512 rows) to sit near the HBM roofline; small
    # batches use a single full-extent block (valid w.r.t. the (8,128) rule).
    tile_b = B if B <= tile_b_max else tile_b_max

    # ---- wrapper-side layout fixups (cheap vs. the X traffic) --------------
    if x.dtype != compute_dtype:
        x = x.astype(compute_dtype)
    w = weight.astype(compute_dtype)
    if (n_pad, k_pad) != (N, K):
        w = jnp.pad(w, ((0, n_pad - N), (0, k_pad - K)))
    if k_pad != K:
        x = jnp.pad(x, ((0, 0), (0, k_pad - K)))

    grid = (pl.cdiv(B, tile_b), k_pad // tile_k)

    # Rough per-step VMEM need (double-buffered X/out + W tiles + f32 acc),
    # capped below v7x's 64 MiB physical VMEM.
    itm = jnp.dtype(compute_dtype).itemsize
    est = (2 * tile_b * tile_k * itm      # X tiles (double buffered)
           + 2 * n_pad * tile_k * itm     # W tiles
           + 2 * tile_b * n_pad * 4       # output tiles (f32)
           + tile_b * n_pad * 4)          # f32 accumulator scratch
    vmem_limit = int(min(max(2 * est, 16 * 1024 * 1024), 48 * 1024 * 1024))

    out = pl.pallas_call(
        logreg_kernel,
        out_shape=jax.ShapeDtypeStruct((B, n_pad), jnp.float32),
        grid_spec=pltpu.PrefetchScalarGridSpec(
            num_scalar_prefetch=0,
            grid=grid,
            in_specs=[
                # X: new batch tile per i, new K tile per k.
                pl.BlockSpec((tile_b, tile_k), lambda i, k: (i, k)),
                # W: same block for every batch step -> stays resident in VMEM.
                pl.BlockSpec((n_pad, tile_k), lambda i, k: (0, k)),
            ],
            out_specs=pl.BlockSpec((tile_b, n_pad), lambda i, k: (i, 0)),
            scratch_shapes=[pltpu.VMEM((tile_b, n_pad), jnp.float32)],
        ),
        compiler_params=pltpu.CompilerParams(
            # Batch axis is independent -> "parallel" (sharded across the two
            # TensorCores on v7x); K is a reduction -> "arbitrary" and last.
            dimension_semantics=("parallel", "arbitrary"),
            vmem_limit_bytes=vmem_limit,
        ),
    )(x, w)

    return out[:, :N]


if __name__ == "__main__":
    key = jax.random.PRNGKey(0)
    kx, kw, kx2, kw2 = jax.random.split(key, 4)

    # --- small case (matches the module's toy sizes) ------------------------
    batch, input_dim, result_dim = 8, 32, 16
    x = jax.random.normal(kx, (batch, input_dim), dtype=jnp.float32)
    bound = 1.0 / jnp.sqrt(jnp.float32(input_dim))
    weight = jax.random.uniform(
        kw, (result_dim, input_dim), dtype=jnp.float32, minval=-bound, maxval=bound
    )

    out = jax.block_until_ready(logreg_forward(x, weight))
    ref = jax.nn.sigmoid(x @ weight.T)
    assert out.shape == (batch, result_dim)
    assert jnp.allclose(out, ref, atol=1e-5, rtol=1e-5)

    # bf16 compute path (f32 accumulation + f32 sigmoid) — looser tolerance.
    out_bf16 = jax.block_until_ready(
        logreg_forward(x, weight, compute_dtype=jnp.bfloat16)
    )
    assert jnp.allclose(out_bf16, ref, atol=2e-2, rtol=2e-2)

    # --- larger case exercising batch tiling (partial tile) + padded N ------
    B2, K2, N2 = 1040, 384, 10
    x2 = jax.random.normal(kx2, (B2, K2), dtype=jnp.float32)
    bound2 = 1.0 / jnp.sqrt(jnp.float32(K2))
    w2 = jax.random.uniform(
        kw2, (N2, K2), dtype=jnp.float32, minval=-bound2, maxval=bound2
    )
    out2 = jax.block_until_ready(logreg_forward(x2, w2))
    ref2 = jax.nn.sigmoid(x2 @ w2.T)
    assert out2.shape == (B2, N2)
    assert jnp.allclose(out2, ref2, atol=1e-5, rtol=1e-5)

    print("KERNEL_OK")
</pallas_src>

<mosaic_0001>
module attributes {stable_mosaic.version = 11 : i64} {
  func.func @logreg_kernel(%arg0: i32, %arg1: i32, %arg2: memref<8x32xf32, #tpu.memory_space<vmem>>, %arg3: memref<128x32xf32, #tpu.memory_space<vmem>>, %arg4: memref<8x128xf32, #tpu.memory_space<vmem>>, %arg5: memref<8x128xf32, #tpu.memory_space<vmem>>) attributes {dimension_semantics = [#tpu.dimension_semantics<parallel>, #tpu.dimension_semantics<arbitrary>], iteration_bounds = array<i64: 1, 1>, scalar_prefetch = 0 : i64, scratch_operands = 1 : i64, tpu.core_type = #tpu.core_type<tc>, window_params = [{transform_indices = @transform_0, window_bounds = array<i64: 8, 32>}, {transform_indices = @transform_1, window_bounds = array<i64: 128, 32>}, {transform_indices = @transform_2, window_bounds = array<i64: 8, 128>}]} {
    %c0_i32 = arith.constant 0 : i32
    %0 = arith.cmpi eq, %arg1, %c0_i32 : i32
    %1 = arith.extui %0 : i1 to i32
    %c0_i32_0 = arith.constant 0 : i32
    %2 = arith.cmpi ne, %1, %c0_i32_0 : i32
    scf.if %2 {
      %cst_10 = arith.constant 0.000000e+00 : f32
      %12 = vector.broadcast %cst_10 : f32 to vector<8x128xf32>
      %c0_11 = arith.constant 0 : index
      %c0_12 = arith.constant 0 : index
      %13 = vector.load %arg5[%c0_11, %c0_12] : memref<8x128xf32, #tpu.memory_space<vmem>>, vector<8x128xf32>
      tpu.vector_store %arg5[%c0_11, %c0_12], %12 {strides = array<i32>} : memref<8x128xf32, #tpu.memory_space<vmem>>, vector<8x128xf32>,
    } else {
    }
    %c0 = arith.constant 0 : index
    %c0_1 = arith.constant 0 : index
    %3 = vector.load %arg5[%c0, %c0_1] : memref<8x128xf32, #tpu.memory_space<vmem>>, vector<8x128xf32>
    %c0_2 = arith.constant 0 : index
    %c0_3 = arith.constant 0 : index
    %4 = vector.load %arg2[%c0_2, %c0_3] : memref<8x32xf32, #tpu.memory_space<vmem>>, vector<8x32xf32>
    %c0_4 = arith.constant 0 : index
    %c0_5 = arith.constant 0 : index
    %5 = vector.load %arg3[%c0_4, %c0_5] : memref<128x32xf32, #tpu.memory_space<vmem>>, vector<128x32xf32>
    %cst = arith.constant dense<0.000000e+00> : vector<8x128xf32>
    %6 = tpu.matmul %4, %5, %cst {dimension_numbers = #tpu.dot_dimension_numbers<[1], [1], [0], [0], [0, 0, 1, 0], [], []>} : vector<8x32xf32>, vector<128x32xf32>, vector<8x128xf32> -> vector<8x128xf32>
    %7 = arith.addf %3, %6 : vector<8x128xf32>
    %c0_6 = arith.constant 0 : index
    %c0_7 = arith.constant 0 : index
    %8 = vector.load %arg5[%c0_6, %c0_7] : memref<8x128xf32, #tpu.memory_space<vmem>>, vector<8x128xf32>
    tpu.vector_store %arg5[%c0_6, %c0_7], %7 {strides = array<i32>} : memref<8x128xf32, #tpu.memory_space<vmem>>, vector<8x128xf32>,
    %c0_i32_8 = arith.constant 0 : i32
    %9 = arith.cmpi eq, %arg1, %c0_i32_8 : i32
    %10 = arith.extui %9 : i1 to i32
    %c0_i32_9 = arith.constant 0 : i32
    %11 = arith.cmpi ne, %10, %c0_i32_9 : i32
    scf.if %11 {
      %c0_10 = arith.constant 0 : index
      %c0_11 = arith.constant 0 : index
      %12 = vector.load %arg5[%c0_10, %c0_11] : memref<8x128xf32, #tpu.memory_space<vmem>>, vector<8x128xf32>
      %13 = arith.negf %12 : vector<8x128xf32>
      %14 = math.exp %13 : vector<8x128xf32>
      %cst_12 = arith.constant 1.000000e+00 : f32
      %15 = vector.broadcast %cst_12 : f32 to vector<8x128xf32>
      %16 = arith.addf %15, %14 : vector<8x128xf32>
      %17 = arith.divf %15, %16 : vector<8x128xf32>
      %c0_13 = arith.constant 0 : index
      %c0_14 = arith.constant 0 : index
      %18 = vector.load %arg4[%c0_13, %c0_14] : memref<8x128xf32, #tpu.memory_space<vmem>>, vector<8x128xf32>
      tpu.vector_store %arg4[%c0_13, %c0_14], %17 {strides = array<i32>} : memref<8x128xf32, #tpu.memory_space<vmem>>, vector<8x128xf32>,
    } else {
    }
    return
  }
  func.func @transform_0(%arg0: i32, %arg1: i32) -> (i32, i32) {
    %c0_i32 = arith.constant 0 : i32
    return %arg0, %arg1 : i32, i32
  }
  func.func @transform_1(%arg0: i32, %arg1: i32) -> (i32, i32) {
    %c0_i32 = arith.constant 0 : i32
    %c0_i32_0 = arith.constant 0 : i32
    return %c0_i32, %arg1 : i32, i32
  }
  func.func @transform_2(%arg0: i32, %arg1: i32) -> (i32, i32) {
    %c0_i32 = arith.constant 0 : i32
    %c0_i32_0 = arith.constant 0 : i32
    return %arg0, %c0_i32 : i32, i32
  }
}

</mosaic_0001>

<bundles_post_ra>
// kernel: tpu_custom_call.1
= control target key start
LH: loop header
LB: loop body
LE: loop exit
PB: predicated region body
PF: predicated region fallthrough
CT: control target
= control target key end

     0   :  { %vm35_vm0 = vcmask 261120   ;;  %v283_v1 = vmov 0.0   ;;  %vm284_vm1 = vmmov 0   ;;  %s372_s0 = inlined_call_operand.vmem [shape: f32[8,32], index: 0, kind: input, shape index: {}]   ;;  %s373_s1 = inlined_call_operand.vmem [shape: f32[128,32], index: 1, kind: input, shape index: {}]   ;;  %s374_s2 = inlined_call_operand.hbm [shape: f32[8,128], index: 2, kind: output, shape index: {}]  }
   0x1   :  { %v34_v0 = vld [vmem:[%s373_s1 + $0x78] sm:$0xff]  ;;  %219 = vmatprep.subr.mxu0 %v283_v1  ;;  %251 = vmatprep.mubr.msk.f32.mxu0 %vm284_vm1, %v283_v1  ;;  %v33_v2 = vld [vmem:[%s373_s1 + $0x70] sm:$0xff] }
   0x2   :  { %220 = vmatpush3.xpose.msk.msra.mxu0 %vm35_vm0, %v34_v0 }
   0x3   :  { %221 = vmatprep.subr.mxu0 %v283_v1 }
   0x4   :  { %7 = vsyncpa [#allocation4], 0  ;;  %v32_v3 = vld [vmem:[%s373_s1 + $0x68] sm:$0xff]  ;;  %v31_v4 = vld [vmem:[%s373_s1 + $0x60] sm:$0xff]  ;;  %s285_s15 = smov [#allocation3]  }
   0x5   :  { %v30_v5 = vld [vmem:[%s373_s1 + $0x58] sm:$0xff]  ;;  %v29_v6 = vld [vmem:[%s373_s1 + $0x50] sm:$0xff]  ;;  %v28_v7 = vld [vmem:[%s373_s1 + $0x48] sm:$0xff]  ;;  %s176_s16 = sshll.u32 %s285_s15, 4  ;;  %s177_s16 = int_to_ptr.vmem [resolvable:$true] %s176_s16 }
   0x6   :  { %222 = vmatpush3.xpose.msk.msra.mxu0 %vm35_vm0, %v33_v2  ;;  %v27_v8 = vld [vmem:[%s373_s1 + $0x40] sm:$0xff]  ;;  %v26_v9 = vld [vmem:[%s373_s1 + $0x38] sm:$0xff]  ;;  %v25_v10 = vld [vmem:[%s373_s1 + $0x30] sm:$0xff]  ;;  %p266_p1 = scmp.lt.s32.totalorder %s177_s16, %s177_s16 }
   0x7   :  { %223 = vmatprep.subr.mxu0 %v283_v1  ;;  %v24_v11 = vld [vmem:[%s373_s1 + $0x28] sm:$0xff]  ;;  %v23_v12 = vld [vmem:[%s373_s1 + $0x20] sm:$0xff]  ;;  %v22_v13 = vld [vmem:[%s373_s1 + $0x18] sm:$0xff] }
   0x8   :  { %v21_v14 = vld [vmem:[%s373_s1 + $0x10] sm:$0xff]  ;;  %v20_v15 = vld [vmem:[%s373_s1 + $0x8] sm:$0xff]  ;;  %v19_v16 = vld [vmem:[%s373_s1] sm:$0xff]  ;;  %s261_s1 = scalar_lea.vmem %s177_s16, 128 }
   0x9   :  { %v18_v17 = vld [vmem:[%s372_s0] sm:$0xff]  ;;  %p262_p0 = scmp.ne.s32.totalorder %s177_s16, %s261_s1  ;;  %p267_p2 = scmp.lt.s32.totalorder %s261_s1, %s261_s1 }
   0xa   :  { %224 = vmatpush3.xpose.msk.msra.mxu0 %vm35_vm0, %v32_v3 }
   0xb   :  { %225 = vmatprep.subr.mxu0 %v283_v1  ;;  %p268_p3 = por %p267_p2, %p266_p1 }
   0xd   :  { %p269_p4 = pnand %p268_p3, %p262_p0 }
   0xe   :  { %226 = vmatpush3.xpose.msk.msra.mxu0 %vm35_vm0, %v31_v4 }
   0xf   :  { %227 = vmatprep.subr.mxu0 %v283_v1 }
  0x12   :  { %228 = vmatpush3.xpose.msk.msra.mxu0 %vm35_vm0, %v30_v5 }
  0x13   :  { %229 = vmatprep.subr.mxu0 %v283_v1 }
  0x16   :  { %230 = vmatpush3.xpose.msk.msra.mxu0 %vm35_vm0, %v29_v6 }
  0x17   :  { %231 = vmatprep.subr.mxu0 %v283_v1 }
  0x1a   :  { %232 = vmatpush3.xpose.msk.msra.mxu0 %vm35_vm0, %v28_v7 }
  0x1b   :  { %233 = vmatprep.subr.mxu0 %v283_v1 }
  0x1e   :  { %234 = vmatpush3.xpose.msk.msra.mxu0 %vm35_vm0, %v27_v8 }
  0x1f   :  { %235 = vmatprep.subr.mxu0 %v283_v1 }
  0x22   :  { %236 = vmatpush3.xpose.msk.msra.mxu0 %vm35_vm0, %v26_v9 }
  0x23   :  { %237 = vmatprep.subr.mxu0 %v283_v1 }
  0x26   :  { %238 = vmatpush3.xpose.msk.msra.mxu0 %vm35_vm0, %v25_v10 }
  0x27   :  { %239 = vmatprep.subr.mxu0 %v283_v1 }
  0x2a   :  { %240 = vmatpush3.xpose.msk.msra.mxu0 %vm35_vm0, %v24_v11 }
  0x2b   :  { %241 = vmatprep.subr.mxu0 %v283_v1 }
  0x2e   :  { %242 = vmatpush3.xpose.msk.msra.mxu0 %vm35_vm0, %v23_v12 }
  0x2f   :  { %243 = vmatprep.subr.mxu0 %v283_v1 }
  0x32   :  { %244 = vmatpush3.xpose.msk.msra.mxu0 %vm35_vm0, %v22_v13 }
  0x33   :  { %245 = vmatprep.subr.mxu0 %v283_v1 }
  0x36   :  { %246 = vmatpush3.xpose.msk.msra.mxu0 %vm35_vm0, %v21_v14 }
  0x37   :  { %247 = vmatprep.subr.mxu0 %v283_v1 }
  0x3a   :  { %248 = vmatpush3.xpose.msk.msra.mxu0 %vm35_vm0, %v20_v15 }
  0x3b   :  { %249 = vmatprep.subr.mxu0 %v283_v1 }
  0x3e   :  { %250 = vmatpush3.xpose.msk.msra.mxu0 %vm35_vm0, %v19_v16 }
  0x41   :  { %252 = vmatmul.mubr.msk.f32.vlgmr.msra.gmra.mxu0 %vm35_vm0, %v18_v17 }
 0x101   :  { %v153_v18 = vpop.f32.mrf.mxu0 }
 0x102   :  { %v201_v19 = vmul.f32 -1.442695, %v153_v18 }
 0x103   :  { %v253_v20 = vpop.f32.mrf.mxu0 }
 0x104   :  { %257 = vpow2.f32 %v201_v19 }
 0x111   :  { %v258_v21 = vpop.eup %257 }
 0x112   :  { %v166_v22 = vadd.f32 1.0, %v258_v21 }
 0x114   :  { %259 = vrcp.f32 %v166_v22 }
 0x121   :  { %v260_v23 = vpop.eup %259 }
 0x122   :  { %169 = vst [vmem:[#allocation3] sm:$0xff] %v260_v23 }
 0x123   :  { %272 = shalt.err (!%p269_p4)
}
 0x124   :  { %179 = dma.vmem_to_hbm [thread:$0]  %s177_s16, 128, %s374_s2, [#allocation4]  }
 0x125   :  { %281 = dma.done.wait [#allocation4], 128  }
 0x126   :  { %282 = vsyncadd [#allocation4], 4294967168 }
 0x127   :  { %183 = vsyncpa [#allocation4], 1 }

</bundles_post_ra>
